<compile_context>
chip_gen: v5e
topology: v5e:2x2
jax: 0.10.0
libtpu: 0.0.40
codegen_flags: <defaults>
</compile_context>

<pallas_src>
import functools

import jax
import jax.numpy as jnp
from jax.experimental import pallas as pl
from jax.experimental.pallas import tpu as pltpu


def _yolo_decode_kernel(coefs_ref, grid_ref, x_ref, o_ref, *,
                        num_classes, num_anchors):
    """Decode a block of batch elements, fused over anchors.

    coefs_ref: VMEM f32 [R, 5]   per-row constants, R = nA*(7+nC):
               col 0: csig  (stride for x/y rows, 1 for conf/cls rows, else 0)
               col 1: cid   (1 for im/re rows, else 0)
               col 2: isx   (1 for x rows)
               col 3: isy   (1 for y rows)
               col 4: cexp  (raw anchor w on w rows, raw anchor l on h rows)
    grid_ref:  VMEM f32 [2, GGc]  row 0 = grid_x*stride, row 1 = grid_y*stride
    x_ref:     VMEM     [Bb, R, GGc]
    o_ref:     VMEM f32 [Bb, R, GGc]   (channel-major, lane-dense)
    """
    c7 = num_classes + 7

    coefs = coefs_ref[...]                    # (R, 5) tiny
    csig = coefs[:, 0:1]
    cid = coefs[:, 1:2]
    isx = coefs[:, 2:3]
    isy = coefs[:, 3:4]
    cexp = coefs[:, 4:5]

    gxs = grid_ref[0:1, :]                    # (1, GGc), already * stride
    gys = grid_ref[1:2, :]                    # (1, GGc)

    # Loop-invariant grid contribution (only nonzero on x/y rows), hoisted.
    grid_add = isx * gxs + isy * gys          # (R, GGc)

    for i in range(x_ref.shape[0]):           # Bb batch elements per step
        xf = x_ref[i].astype(jnp.float32)     # (R, GGc) dense load
        sig = jax.nn.sigmoid(xf)              # EUP, full slab (x/y/conf/cls)

        # x/y rows: sigmoid*stride + grid*stride ; im/re rows: passthrough ;
        # conf/cls rows: sigmoid ; w/l rows: 0 (overwritten below).
        o_ref[i] = sig * csig + xf * cid + grid_add      # one dense store

        # w/l rows: exp restricted to 2 rows per anchor (no full-slab exp).
        for a in range(num_anchors):
            r0 = a * c7 + 2
            wh = xf[r0:r0 + 2, :]                         # (2, GGc)
            o_ref[i, r0:r0 + 2, :] = (
                jnp.minimum(jnp.exp(wh), 1000.0) * cexp[r0:r0 + 2, :])


def yolo_layer_forward(x, anchors, num_classes, img_size=608, targets=None,
                       channel_major_output=False):
    """JAX/Pallas equivalent of YoloLayer.forward (inference).

    x:       [B, nA*(7+nC), G, G]  (NCHW, like PyTorch)
    anchors: f32 [nA, 4]  (w, l, im, re) -- only w, l are used in forward
    Returns (output [B, nA*G*G, 7+nC], 0)     (channel_major_output=True gives
    the lane-dense [B, nA, 7+nC, G*G] layout with no extra HBM transpose pass)
    """
    B, C, G, G2 = x.shape
    assert G == G2
    nA = anchors.shape[0]
    C7 = num_classes + 7
    R = nA * C7
    assert C == R
    GG = G * G

    stride = float(img_size) / float(G)

    # Contiguous reshape only (no data movement); f32 cast happens in-kernel.
    x_view = x.reshape(B, R, GG)

    # --- Tiny host-side per-row coefficient table (stride folded in) ------
    c = jnp.arange(R, dtype=jnp.int32) % C7
    aw_rows = jnp.repeat(anchors[:, 0].astype(jnp.float32), C7)   # raw w
    ah_rows = jnp.repeat(anchors[:, 1].astype(jnp.float32), C7)   # raw l
    csig = jnp.where(c < 2, stride, jnp.where(c >= 6, 1.0, 0.0))
    cid = jnp.where((c == 4) | (c == 5), 1.0, 0.0)
    isx = (c == 0).astype(jnp.float32)
    isy = (c == 1).astype(jnp.float32)
    cexp = jnp.where(c == 2, aw_rows, 0.0) + jnp.where(c == 3, ah_rows, 0.0)
    coefs = jnp.stack([csig, cid, isx, isy, cexp], axis=1).astype(jnp.float32)

    # Lane-dense grid offsets, pre-scaled by stride:  idx = i*G + j
    gx = jnp.tile(jnp.arange(G, dtype=jnp.float32), (G,)) * stride   # j*stride
    gy = jnp.repeat(jnp.arange(G, dtype=jnp.float32), G) * stride    # i*stride
    grid_xy = jnp.stack([gx, gy], axis=0)                            # (2, GG)

    # --- Grid / block selection -------------------------------------------
    # Block several batch elements per step when B is large (amortizes the
    # ~0.35 us per-step overhead), but keep >= 2 grid steps for megacore /
    # pipelining; stay well under the scoped-VMEM default (in+out, 2x buffered).
    itemsize = jnp.dtype(x.dtype).itemsize
    vmem_budget = 8 * 1024 * 1024

    def _fits(bb):
        return bb * R * GG * (4 + itemsize) * 2 <= vmem_budget

    Bb = 1
    for bb in range(1, B + 1):
        if B % bb == 0 and B // bb >= 2 and _fits(bb):
            Bb = bb

    # For batch-1 inference give v7x's second TensorCore work by splitting GG
    # into two 128-aligned chunks (full extent otherwise -- GG need not be a
    # multiple of 128 when the block covers the whole axis).
    n_gg = 2 if (B == 1 and GG % 256 == 0) else 1
    GGc = GG // n_gg

    kernel = functools.partial(
        _yolo_decode_kernel, num_classes=num_classes, num_anchors=nA)

    out = pl.pallas_call(
        kernel,
        out_shape=jax.ShapeDtypeStruct((B, R, GG), jnp.float32),
        grid_spec=pltpu.PrefetchScalarGridSpec(
            num_scalar_prefetch=0,
            grid=(B // Bb, n_gg),
            in_specs=[
                pl.BlockSpec((R, 5), lambda b, j: (0, 0)),
                pl.BlockSpec((2, GGc), lambda b, j: (0, j)),
                pl.BlockSpec((Bb, R, GGc), lambda b, j: (b, 0, j)),
            ],
            out_specs=pl.BlockSpec((Bb, R, GGc), lambda b, j: (b, 0, j)),
        ),
        compiler_params=pltpu.CompilerParams(
            dimension_semantics=("parallel", "parallel"),
        ),
    )(coefs, grid_xy, x_view)

    if channel_major_output:
        # Lane-dense layout for downstream fusion (no extra HBM pass).
        output = out.reshape(B, nA, C7, GG)
    else:
        # PyTorch layout: [B,R,GG] -> [B,nA,C7,GG] -> [B,nA,GG,C7] -> [B,nA*GG,C7]
        output = jnp.transpose(
            out.reshape(B, nA, C7, GG), (0, 1, 3, 2)).reshape(B, nA * GG, C7)

    if targets is None:
        return output, 0
    # TODO(synk): training loss path (build_targets with rotated-polygon IoU via
    # shapely, masked MSE/BCE losses) has no clean Pallas equivalent; only the
    # targets=None inference path is implemented.
    return output, 0


def _yolo_reference(x, anchors, num_classes, img_size):
    """Pure-JAX reference mirroring the PyTorch forward math exactly."""
    B, C, G, _ = x.shape
    nA = anchors.shape[0]
    C7 = num_classes + 7
    stride = float(img_size) / float(G)

    pred = x.reshape(B, nA, C7, G, G).transpose(0, 3, 4, 1, 2)  # [B,G,G,nA,C7]
    px = jax.nn.sigmoid(pred[..., 0])
    py = jax.nn.sigmoid(pred[..., 1])
    pw = pred[..., 2]
    ph = pred[..., 3]
    pim = pred[..., 4]
    pre = pred[..., 5]
    pconf = jax.nn.sigmoid(pred[..., 6])
    pcls = jax.nn.sigmoid(pred[..., 7:])

    grid_x = jnp.arange(G, dtype=jnp.float32).reshape(1, 1, G, 1)  # [.,i,j,.] = j
    grid_y = jnp.arange(G, dtype=jnp.float32).reshape(1, G, 1, 1)  # [.,i,j,.] = i
    anchor_w = (anchors[:, 0] / stride).reshape(1, 1, 1, nA)
    anchor_h = (anchors[:, 1] / stride).reshape(1, 1, 1, nA)

    bx = px + grid_x
    by = py + grid_y
    bw = jnp.minimum(jnp.exp(pw), 1000.0) * anchor_w
    bh = jnp.minimum(jnp.exp(ph), 1000.0) * anchor_h

    out = jnp.concatenate(
        [
            (bx * stride)[..., None],
            (by * stride)[..., None],
            (bw * stride)[..., None],
            (bh * stride)[..., None],
            pim[..., None],
            pre[..., None],
            pconf[..., None],
            pcls,
        ],
        axis=-1,
    )  # [B, G, G, nA, C7]
    return out.transpose(0, 3, 1, 2, 4).reshape(B, -1, C7)


if __name__ == "__main__":
    num_classes = 3       # Complex-YOLOv4 (Car / Pedestrian / Cyclist)
    num_anchors = 3
    B, G = 2, 16
    img_size = 608
    C = num_anchors * (num_classes + 7)   # 30

    key = jax.random.PRNGKey(0)
    x = jax.random.normal(key, (B, C, G, G), dtype=jnp.float32)

    # Deterministic anchors (w, l, im, re), typical Complex-YOLO style.
    anchors = jnp.array(
        [[11.0, 14.0, 0.0, 0.0],
         [24.0, 28.0, 0.0, 0.0],
         [37.0, 58.0, 0.0, 0.0]],
        dtype=jnp.float32,
    )

    out, loss = yolo_layer_forward(x, anchors, num_classes, img_size=img_size)
    out = jax.block_until_ready(out)

    ref = _yolo_reference(x, anchors, num_classes, img_size)
    assert out.shape == (B, num_anchors * G * G, num_classes + 7)
    assert loss == 0
    if not jnp.allclose(out, ref, rtol=1e-4, atol=1e-4):
        max_err = jnp.max(jnp.abs(out - ref))
        raise AssertionError(
            f"Pallas YoloLayer output mismatch vs JAX reference (max abs err {max_err})")

    print("KERNEL_OK")
</pallas_src>

<mosaic_0001>
module attributes {stable_mosaic.version = 11 : i64} {
  func.func @_yolo_decode_kernel(%arg0: i32, %arg1: i32, %arg2: memref<30x5xf32, #tpu.memory_space<vmem>>, %arg3: memref<2x256xf32, #tpu.memory_space<vmem>>, %arg4: memref<1x30x256xf32, #tpu.memory_space<vmem>>, %arg5: memref<1x30x256xf32, #tpu.memory_space<vmem>>) attributes {dimension_semantics = [#tpu.dimension_semantics<parallel>, #tpu.dimension_semantics<parallel>], iteration_bounds = array<i64: 2, 1>, scalar_prefetch = 0 : i64, scratch_operands = 0 : i64, tpu.core_type = #tpu.core_type<tc>, window_params = [{pipeline_mode = #tpu.pipeline_mode<synchronous>, transform_indices = @transform_0, window_bounds = array<i64: 30, 5>}, {transform_indices = @transform_1, window_bounds = array<i64: 2, 256>}, {transform_indices = @transform_2, window_bounds = array<i64: 1, 30, 256>}, {transform_indices = @transform_3, window_bounds = array<i64: 1, 30, 256>}]} {
    %c0 = arith.constant 0 : index
    %c0_0 = arith.constant 0 : index
    %0 = vector.load %arg2[%c0, %c0_0] : memref<30x5xf32, #tpu.memory_space<vmem>>, vector<30x5xf32>
    %1 = vector.extract_strided_slice %0 {offsets = [0, 0], sizes = [30, 1], strides = [1, 1]} : vector<30x5xf32> to vector<30x1xf32>
    %2 = vector.extract_strided_slice %0 {offsets = [0, 1], sizes = [30, 1], strides = [1, 1]} : vector<30x5xf32> to vector<30x1xf32>
    %3 = vector.extract_strided_slice %0 {offsets = [0, 2], sizes = [30, 1], strides = [1, 1]} : vector<30x5xf32> to vector<30x1xf32>
    %4 = vector.extract_strided_slice %0 {offsets = [0, 3], sizes = [30, 1], strides = [1, 1]} : vector<30x5xf32> to vector<30x1xf32>
    %5 = vector.extract_strided_slice %0 {offsets = [0, 4], sizes = [30, 1], strides = [1, 1]} : vector<30x5xf32> to vector<30x1xf32>
    %c0_1 = arith.constant 0 : index
    %c0_2 = arith.constant 0 : index
    %6 = vector.load %arg3[%c0_1, %c0_2] : memref<2x256xf32, #tpu.memory_space<vmem>>, vector<1x256xf32>
    %c1 = arith.constant 1 : index
    %c0_3 = arith.constant 0 : index
    %7 = vector.load %arg3[%c1, %c0_3] : memref<2x256xf32, #tpu.memory_space<vmem>>, vector<1x256xf32>
    %8 = vector.broadcast %3 : vector<30x1xf32> to vector<30x256xf32>
    %9 = vector.broadcast %6 : vector<1x256xf32> to vector<30x256xf32>
    %10 = arith.mulf %8, %9 : vector<30x256xf32>
    %11 = vector.broadcast %4 : vector<30x1xf32> to vector<30x256xf32>
    %12 = vector.broadcast %7 : vector<1x256xf32> to vector<30x256xf32>
    %13 = arith.mulf %11, %12 : vector<30x256xf32>
    %14 = arith.addf %10, %13 : vector<30x256xf32>
    %c0_4 = arith.constant 0 : index
    %c0_5 = arith.constant 0 : index
    %c0_6 = arith.constant 0 : index
    %15 = vector.load %arg4[%c0_4, %c0_5, %c0_6] : memref<1x30x256xf32, #tpu.memory_space<vmem>>, vector<1x30x256xf32>
    %16 = vector.shape_cast %15 : vector<1x30x256xf32> to vector<30x256xf32>
    %17 = arith.negf %16 : vector<30x256xf32>
    %18 = math.exp %17 : vector<30x256xf32>
    %cst = arith.constant 1.000000e+00 : f32
    %19 = vector.broadcast %cst : f32 to vector<30x256xf32>
    %20 = arith.addf %19, %18 : vector<30x256xf32>
    %21 = arith.divf %19, %20 : vector<30x256xf32>
    %22 = vector.broadcast %1 : vector<30x1xf32> to vector<30x256xf32>
    %23 = arith.mulf %21, %22 : vector<30x256xf32>
    %24 = vector.broadcast %2 : vector<30x1xf32> to vector<30x256xf32>
    %25 = arith.mulf %16, %24 : vector<30x256xf32>
    %26 = arith.addf %23, %25 : vector<30x256xf32>
    %27 = arith.addf %26, %14 : vector<30x256xf32>
    %c0_7 = arith.constant 0 : index
    %c0_8 = arith.constant 0 : index
    %c0_9 = arith.constant 0 : index
    %28 = vector.load %arg5[%c0_7, %c0_8, %c0_9] : memref<1x30x256xf32, #tpu.memory_space<vmem>>, vector<1x30x256xf32>
    %29 = vector.shape_cast %28 : vector<1x30x256xf32> to vector<30x256xf32>
    %30 = vector.shape_cast %27 : vector<30x256xf32> to vector<1x30x256xf32>
    tpu.vector_store %arg5[%c0_7, %c0_8, %c0_9], %30 {strides = array<i32>} : memref<1x30x256xf32, #tpu.memory_space<vmem>>, vector<1x30x256xf32>,
    %31 = vector.extract_strided_slice %16 {offsets = [2, 0], sizes = [2, 256], strides = [1, 1]} : vector<30x256xf32> to vector<2x256xf32>
    %32 = math.exp %31 : vector<2x256xf32>
    %cst_10 = arith.constant 1.000000e+03 : f32
    %33 = vector.broadcast %cst_10 : f32 to vector<2x256xf32>
    %34 = arith.minimumf %32, %33 : vector<2x256xf32>
    %35 = vector.extract_strided_slice %5 {offsets = [2, 0], sizes = [2, 1], strides = [1, 1]} : vector<30x1xf32> to vector<2x1xf32>
    %36 = vector.broadcast %35 : vector<2x1xf32> to vector<2x256xf32>
    %37 = arith.mulf %34, %36 : vector<2x256xf32>
    %c0_11 = arith.constant 0 : index
    %c2 = arith.constant 2 : index
    %c0_12 = arith.constant 0 : index
    %38 = vector.load %arg5[%c0_11, %c2, %c0_12] : memref<1x30x256xf32, #tpu.memory_space<vmem>>, vector<1x2x256xf32>
    %39 = vector.shape_cast %38 : vector<1x2x256xf32> to vector<2x256xf32>
    %40 = vector.shape_cast %37 : vector<2x256xf32> to vector<1x2x256xf32>
    tpu.vector_store %arg5[%c0_11, %c2, %c0_12], %40 {strides = array<i32>} : memref<1x30x256xf32, #tpu.memory_space<vmem>>, vector<1x2x256xf32>,
    %41 = vector.extract_strided_slice %16 {offsets = [12, 0], sizes = [2, 256], strides = [1, 1]} : vector<30x256xf32> to vector<2x256xf32>
    %42 = math.exp %41 : vector<2x256xf32>
    %cst_13 = arith.constant 1.000000e+03 : f32
    %43 = vector.broadcast %cst_13 : f32 to vector<2x256xf32>
    %44 = arith.minimumf %42, %43 : vector<2x256xf32>
    %45 = vector.extract_strided_slice %5 {offsets = [12, 0], sizes = [2, 1], strides = [1, 1]} : vector<30x1xf32> to vector<2x1xf32>
    %46 = vector.broadcast %45 : vector<2x1xf32> to vector<2x256xf32>
    %47 = arith.mulf %44, %46 : vector<2x256xf32>
    %c0_14 = arith.constant 0 : index
    %c12 = arith.constant 12 : index
    %c0_15 = arith.constant 0 : index
    %48 = vector.load %arg5[%c0_14, %c12, %c0_15] : memref<1x30x256xf32, #tpu.memory_space<vmem>>, vector<1x2x256xf32>
    %49 = vector.shape_cast %48 : vector<1x2x256xf32> to vector<2x256xf32>
    %50 = vector.shape_cast %47 : vector<2x256xf32> to vector<1x2x256xf32>
    tpu.vector_store %arg5[%c0_14, %c12, %c0_15], %50 {strides = array<i32>} : memref<1x30x256xf32, #tpu.memory_space<vmem>>, vector<1x2x256xf32>,
    %51 = vector.extract_strided_slice %16 {offsets = [22, 0], sizes = [2, 256], strides = [1, 1]} : vector<30x256xf32> to vector<2x256xf32>
    %52 = math.exp %51 : vector<2x256xf32>
    %cst_16 = arith.constant 1.000000e+03 : f32
    %53 = vector.broadcast %cst_16 : f32 to vector<2x256xf32>
    %54 = arith.minimumf %52, %53 : vector<2x256xf32>
    %55 = vector.extract_strided_slice %5 {offsets = [22, 0], sizes = [2, 1], strides = [1, 1]} : vector<30x1xf32> to vector<2x1xf32>
    %56 = vector.broadcast %55 : vector<2x1xf32> to vector<2x256xf32>
    %57 = arith.mulf %54, %56 : vector<2x256xf32>
    %c0_17 = arith.constant 0 : index
    %c22 = arith.constant 22 : index
    %c0_18 = arith.constant 0 : index
    %58 = vector.load %arg5[%c0_17, %c22, %c0_18] : memref<1x30x256xf32, #tpu.memory_space<vmem>>, vector<1x2x256xf32>
    %59 = vector.shape_cast %58 : vector<1x2x256xf32> to vector<2x256xf32>
    %60 = vector.shape_cast %57 : vector<2x256xf32> to vector<1x2x256xf32>
    tpu.vector_store %arg5[%c0_17, %c22, %c0_18], %60 {strides = array<i32>} : memref<1x30x256xf32, #tpu.memory_space<vmem>>, vector<1x2x256xf32>,
    return
  }
  func.func @transform_0(%arg0: i32, %arg1: i32) -> (i32, i32) {
    %c0_i32 = arith.constant 0 : i32
    %c0_i32_0 = arith.constant 0 : i32
    %c0_i32_1 = arith.constant 0 : i32
    return %c0_i32, %c0_i32_0 : i32, i32
  }
  func.func @transform_1(%arg0: i32, %arg1: i32) -> (i32, i32) {
    %c0_i32 = arith.constant 0 : i32
    %c0_i32_0 = arith.constant 0 : i32
    return %c0_i32, %arg1 : i32, i32
  }
  func.func @transform_2(%arg0: i32, %arg1: i32) -> (i32, i32, i32) {
    %c0_i32 = arith.constant 0 : i32
    %c0_i32_0 = arith.constant 0 : i32
    return %arg0, %c0_i32, %arg1 : i32, i32, i32
  }
  func.func @transform_3(%arg0: i32, %arg1: i32) -> (i32, i32, i32) {
    %c0_i32 = arith.constant 0 : i32
    %c0_i32_0 = arith.constant 0 : i32
    return %arg0, %c0_i32, %arg1 : i32, i32, i32
  }
}

</mosaic_0001>

<bundles_post_ra>
// kernel: tpu_custom_call.1
= control target key start
LH: loop header
LB: loop body
LE: loop exit
PB: predicated region body
PF: predicated region fallthrough
CT: control target
= control target key end

     0   :  { %s843_s12 = smov 0   ;;  %s845_s13 = smov 0   ;;  %s1264_s0 = inlined_call_operand.vmem [shape: f32[30,5], index: 0, kind: input, shape index: {}]   ;;  %s1265_s1 = inlined_call_operand.vmem [shape: f32[2,256], index: 1, kind: input, shape index: {}]   ;;  %s1266_s2 = inlined_call_operand.vmem [shape: f32[2,30,256], index: 2, kind: input, shape index: {}]   ;;  %s1267_s3 = inlined_call_operand.vmem [shape: f32[2,30,256], index: 3, kind: output, shape index: {}]  }
   0x1   :  { %s847_s14 = smov 0  }
   0x2 LB: > { %s25_s15 = sadd.s32 1, %s812_s13  ;;  %p690_p0 = scmp.ge.s32.totalorder %s816_s14, 1  ;;  %s816_s14 = sphi %s847_s14, %s13_s14   ;;  %s812_s13 = sphi %s845_s13, %s1301_s13   ;;  %s808_s12 = sphi %s843_s12, %s1300_s12  }
   0x3   : > { %p27_p1 = scmp.ge.s32.totalorder %s25_s15, 2  ;;  %p169_p2 = scmp.lt.s32.totalorder %s816_s14, 3 }
   0x5   : > { %s1303_s15 = smov (%p27_p1, %s25_s15), 0  ;;  %p170_p3 = pnand %p690_p0, %p169_p2 }
   0x7   : > { %173 = sbr.rel (%p170_p3) target bundleno = 185 (0xb9), region = 32 }
   0xc   : > { %v234_v0 = vld [vmem:[%s1264_s0 + $0x10] sm:$0xff]  ;;  %v232_v1 = vld [vmem:[%s1264_s0] sm:$0xff]  ;;  %v818_v2 = vmov 2   ;;  %v819_v3 = vmov 3   ;;  %v235_v4 = vld [vmem:[%s1264_s0 + $0x18] sm:$0x3f] }
   0xd   : > { %738 = vset.pattern.permute.xlu1 %v818_v2  ;;  %737 = vset.pattern.permute.xlu0 %v818_v2  ;;  %v233_v5 = vld [vmem:[%s1264_s0 + $0x8] sm:$0xff]  ;;  %v820_v6 = vmov 0   ;;  %v821_v7 = vmov 1   ;;  %v822_v8 = vmov 4   ;;  %p213_p4 = scmp.lt.s32.totalorder %s808_s12, 1 }
   0xe   : > { %251 = vperm.xlu1 %738, %v234_v0   ;;  %241 = vperm.xlu0 %737, %v232_v1   ;;  %v695_v52 = vld [vmem:[%s1265_s1 + $0x1] ss:$2 sm:$0x3]  ;;  %v236_v54 = vld [vmem:[%s1265_s1] ss:$2 sm:$0x3] }
   0xf   : > { %739 = vset.pattern.permute.xlu2 %v819_v3  ;;  %s1305_s12 = smov (!%p213_p4, %s808_s12), 1  ;;  %v971_v60 = vperm.slane %v695_v52, 0  ;;  %v981_v2 = vperm.slane %v236_v54, 0 }
  0x10   : > { %273 = vperm.xlu2 %739, %v232_v1   ;;  %s706_s24 = sshll.u32 %s1305_s12, 6 }
  0x11   : > { %s220_s27 = scalar_lea.vmem %s1266_s2, %s706_s24  ;;  %s1169_s7 = scalar_lea.vmem %s1267_s3, %s706_s24 }
  0x12   : > { %v885_v9 = vld [vmem:[%s220_s27] sm:$0xff]  ;;  %v887_v10 = vld [vmem:[%s220_s27 + $0x8] sm:$0xff]  ;;  %v890_v12 = vld [vmem:[%s220_s27 + $0x10] sm:$0xff] }
  0x13   : > { %v696_v11 = vmul.f32 -1.442695, %v885_v9  ;;  %v892_v13 = vld [vmem:[%s220_s27 + $0x18] sm:$0xff]  ;;  %v697_v14 = vmul.f32 -1.442695, %v887_v10  ;;  %v903_v20 = vld [vmem:[%s220_s27 + $0x20] sm:$0xff] }
  0x14   : > { %v895_v15 = vld [vmem:[%s220_s27 + $0x30] sm:$0x3f]  ;;  %v698_v16 = vmul.f32 -1.442695, %v890_v12  ;;  %v898_v17 = vld [vmem:[%s220_s27 + $0x38] sm:$0x3f] }
  0x15   : > { %750 = vpow2.f32 %v696_v11  ;;  %v699_v18 = vmul.f32 -1.442695, %v892_v13  ;;  %v702_v21 = vmul.f32 -1.442695, %v895_v15  ;;  %v906_v22 = vld [vmem:[%s220_s27 + $0x28] sm:$0xff] }
  0x16   : > { %256 = vperm.xlu1 %738, %v235_v4   ;;  %246 = vperm.xlu0 %737, %v233_v5   ;;  %752 = vpow2.f32 %v697_v14  ;;  %v703_v23 = vmul.f32 -1.442695, %v898_v17  ;;  %v700_v24 = vmul.f32 -1.442695, %v903_v20  ;;  %v701_v25 = vmul.f32 -1.442695, %v906_v22 }
  0x17   : > { %754 = vpow2.f32 %v698_v16 }
  0x18   : > { %277 = vperm.xlu2 %739, %v233_v5   ;;  %756 = vpow2.f32 %v699_v18 }
  0x19   : > { %758 = vpow2.f32 %v702_v21 }
  0x1a   : > { %760 = vpow2.f32 %v703_v23 }
  0x1b   : > { %v751_v26 = vpop.eup %750  ;;  %762 = vpow2.f32 %v700_v24 }
  0x1c   : > { %v753_v27 = vpop.eup %752  ;;  %v913_v30 = vadd.f32 1.0, %v751_v26  ;;  %764 = vpow2.f32 %v701_v25 }
  0x1d   : > { %v755_v28 = vpop.eup %754  ;;  %v915_v33 = vadd.f32 1.0, %v753_v27 }
  0x1e   : > { %741 = vset.pattern.permute.xlu1 %v819_v3  ;;  %740 = vset.pattern.permute.xlu0 %v819_v3  ;;  %v757_v31 = vpop.eup %756  ;;  %v917_v35 = vadd.f32 1.0, %v755_v28  ;;  %766 = vrcp.f32 %v913_v30  ;;  %v360_v61 = vand.u32 2147483648, %v913_v30  ;;  %vm354_vm0 = vweird.f32 %v913_v30 }
  0x1f   : > { %285 = vperm.xlu1 %741, %v235_v4   ;;  %281 = vperm.xlu0 %740, %v234_v0   ;;  %v759_v32 = vpop.eup %758  ;;  %v920_v36 = vadd.f32 1.0, %v757_v31  ;;  %768 = vrcp.f32 %v915_v33  ;;  %v375_v62 = vand.u32 2147483648, %v915_v33  ;;  %vm369_vm1 = vweird.f32 %v915_v33 }
  0x20   : > { %742 = vset.pattern.permute.xlu2 %v820_v6  ;;  %v761_v34 = vpop.eup %760  ;;  %v922_v38 = vadd.f32 1.0, %v759_v32  ;;  %770 = vrcp.f32 %v917_v35  ;;  %v995_v18 = vor.u32 1.1754944e-38, %v360_v61  ;;  %vm384_vm4 = vweird.f32 %v917_v35 }
  0x21   : > { %470 = vperm.xlu2 %742, %v232_v1   ;;  %v763_v37 = vpop.eup %762  ;;  %v925_v40 = vadd.f32 1.0, %v761_v34  ;;  %772 = vrcp.f32 %v920_v36  ;;  %v998_v21 = vor.u32 1.1754944e-38, %v375_v62  ;;  %vm399_vm6 = vweird.f32 %v920_v36 }
  0x22   : > { %v765_v39 = vpop.eup %764  ;;  %v928_v41 = vadd.f32 1.0, %v763_v37  ;;  %774 = vrcp.f32 %v922_v38  ;;  %vm444_vm9 = vweird.f32 %v922_v38 }
  0x23   : > { %v933_v43 = vadd.f32 1.0, %v765_v39  ;;  %776 = vrcp.f32 %v925_v40  ;;  %vm459_vm12 = vweird.f32 %v925_v40 }
  0x24   : > { %v936_v44 = vpop.eup %766  ;;  %778 = vrcp.f32 %v928_v41 }
  0x25   : > { %v939_v45 = vpop.eup %768  ;;  %v350_v47 = vmul.f32 %v936_v44, %v913_v30  ;;  %780 = vrcp.f32 %v933_v43  ;;  %vm355_vm2 = vweird.f32 %v936_v44 }
  0x26   : > { %v942_v46 = vpop.eup %770  ;;  %v365_v56 = vmul.f32 %v939_v45, %v915_v33  ;;  %vm370_vm3 = vweird.f32 %v939_v45  ;;  %vm1036_vm8 = vmor %vm354_vm0, %vm355_vm2 }
  0x27   : > { %743 = vset.pattern.permute.xlu1 %v820_v6  ;;  %744 = vset.pattern.permute.xlu0 %v820_v6  ;;  %v947_v48 = vpop.eup %772  ;;  %v351_v55 = vsub.f32 1.0, %v350_v47  ;;  %v380_v58 = vmul.f32 %v942_v46, %v917_v35  ;;  %v358_v6 = vand.u32 2147483647, %v913_v30  ;;  %vm385_vm5 = vweird.f32 %v942_v46 }
  0x28   : > { %474 = vperm.xlu1 %743, %v233_v5   ;;  %482 = vperm.xlu0 %744, %v235_v4   ;;  %v953_v51 = vpop.eup %774  ;;  %v395_v63 = vmul.f32 %v947_v48, %v920_v36  ;;  %v366_v11 = vsub.f32 1.0, %v365_v56  ;;  %vm400_vm7 = vweird.f32 %v947_v48  ;;  %vm1045_vm11 = vmor %vm384_vm4, %vm385_vm5  ;;  %v388_v30 = vand.u32 2147483647, %v917_v35 }
  0x29   : > { %478 = vperm.xlu2 %742, %v234_v0   ;;  %v958_v53 = vpop.eup %776  ;;  %v440_v3 = vmul.f32 %v953_v51, %v922_v38  ;;  %v381_v16 = vsub.f32 1.0, %v380_v58  ;;  %vm445_vm10 = vweird.f32 %v953_v51  ;;  %vm1055_vm14 = vmor %vm399_vm6, %vm400_vm7  ;;  %vm1093_vm2 = vcmp.eq.f32.partialorder %v358_v6, 8.507059e+37 }
  0x2a   : > { %v969_v59 = vpop.eup %778  ;;  %v396_v26 = vsub.f32 1.0, %v395_v63  ;;  %v367_v47 = vmul.f32 %v939_v45, %v366_v11  ;;  %v390_v63 = vand.u32 2147483648, %v917_v35  ;;  %vm460_vm13 = vweird.f32 %v958_v53  ;;  %vm1067_vm15 = vmor %vm444_vm9, %vm445_vm10 }
  0x2b   : > { %v410_v14 = vmul.f32 %v969_v59, %v928_v41  ;;  %v441_v27 = vsub.f32 1.0, %v440_v3  ;;  %v405_v3 = vand.u32 2147483648, %v920_v36  ;;  %vm1089_vm0 = vmor %vm459_vm12, %vm460_vm13  ;;  %vm1108_vm5 = vcmp.eq.f32.partialorder %v388_v30, 8.507059e+37 }
  0x2c   : > { %vm1101_vm4 = vmor %vm369_vm1, %vm370_vm3  ;;  %v391_v6 = vor.u32 1.1754944e-38, %v390_v63  ;;  %vm414_vm6 = vweird.f32 %v928_v41  ;;  %vm415_vm7 = vweird.f32 %v969_v59  ;;  %vm429_vm10 = vweird.f32 %v933_v43 }
  0x2d   : > { %v442_v58 = vmul.f32 %v953_v51, %v441_v27  ;;  %vm1180_vm12 = vmor %vm414_vm6, %vm415_vm7 }
  0x30   : > { %745 = vset.pattern.permute.xlu1 %v821_v7  ;;  %747 = vset.pattern.permute.xlu0 %v822_v8 }
  0x31   : > { %494 = vperm.xlu1 %745, %v232_v1   ;;  %746 = vset.pattern.permute.xlu2 %v821_v7  ;;  %v1079_v7 = vadd.f32 %v939_v45, %v367_v47  ;;  %v406_v47 = vor.u32 1.1754944e-38, %v405_v3 }
  0x32   : > { %498 = vperm.xlu2 %746, %v233_v5   ;;  %548 = vperm.xlu0 %747, %v232_v1   ;;  %v979_v1 = vperm.slane %v695_v52, 1  ;;  %v411_v52 = vsub.f32 1.0, %v410_v14 }
  0x33   : > { %v372_v30 = vsel %vm1101_vm4, %v939_v45, %v1079_v7 }
  0x39   : > { %502 = vperm.xlu1 %745, %v234_v0  }
  0x3a   : > { %506 = vperm.xlu2 %746, %v235_v4   ;;  %v455_v4 = vmul.f32 %v958_v53, %v925_v40 }
  0x3c   : > { %v456_v28 = vsub.f32 1.0, %v455_v4 }
  0x3e   : > { %v457_v61 = vmul.f32 %v958_v53, %v456_v28  ;;  %v443_v28 = vadd.f32 %v953_v51, %v442_v58  ;;  %v412_v58 = vmul.f32 %v969_v59, %v411_v52 }
  0x40   : > { %v458_v37 = vadd.f32 %v958_v53, %v457_v61  ;;  %v447_v63 = vsel %vm1067_vm15, %v953_v51, %v443_v28  ;;  %v541_v51 = vmul.f32 1.442695, %v885_v9  ;;  %v569_v61 = vmul.f32 1.442695, %v903_v20 }
  0x41   : > { %748 = vset.pattern.permute.xlu1 %v822_v8 }
  0x42   : > { %562 = vperm.xlu1 %748, %v233_v5   ;;  %749 = vset.pattern.permute.xlu2 %v822_v8  ;;  %v987_v5 = vperm.slane %v236_v54, 1  ;;  %v352_v8 = vmul.f32 %v936_v44, %v351_v55  ;;  %v382_v54 = vmul.f32 %v942_v46, %v381_v16  ;;  %v403_v16 = vand.u32 2147483647, %v920_v36 }
  0x43   : > { %576 = vperm.xlu2 %749, %v234_v0   ;;  %v977_v0 = vpop.eup %780  ;;  %v463_v36 = vand.u32 2147483647, %v925_v40  ;;  %782 = vpow2.f32 %v541_v51 }
  0x44   : > { %v425_v25 = vmul.f32 %v977_v0, %v933_v43  ;;  %v1019_v39 = vadd.f32 %v936_v44, %v352_v8  ;;  %v383_v4 = vadd.f32 %v942_v46, %v382_v54  ;;  %vm1117_vm1 = vcmp.eq.f32.partialorder %v403_v16, 8.507059e+37 }
  0x45   : > { %vm464_vm9 = vcmp.eq.f32.partialorder %v463_v36, 8.507059e+37  ;;  %v433_v8 = vand.u32 2147483647, %v933_v43 }
  0x46   : > { %v426_v55 = vsub.f32 1.0, %v425_v25  ;;  %v450_v25 = vand.u32 2147483648, %v922_v38  ;;  %v357_v34 = vsel %vm1036_vm8, %v936_v44, %v1019_v39 }
  0x47   : > { %vm434_vm15 = vcmp.eq.f32.partialorder %v433_v8, 8.507059e+37 }
  0x48   : > { %v451_v62 = vor.u32 1.1754944e-38, %v450_v25  ;;  %v543_v25 = vmul.f32 1.442695, %v887_v10 }
  0x4a   : > { %784 = vpow2.f32 %v543_v25 }
  0x4b   : > { %786 = vpow2.f32 %v569_v61 }
  0x6a   : > { %v901_v19 = vpop.permute.xlu2 %273 }
  0x6b   : > { %v1010_v31 = vmul.f32 %v971_v60, %v901_v19  ;;  %v1014_v32 = vmul.f32 %v979_v1, %v901_v19  ;;  %v397_v19 = vmul.f32 %v947_v48, %v396_v26  ;;  %v465_v26 = vand.u32 2147483648, %v925_v40 }
  0x6c   : > { %v387_v40 = vsel %vm1045_vm11, %v942_v46, %v383_v4  ;;  %v1288_v4 = vand.u32 2147483647, %v915_v33  ;;  %vm430_vm11 = vweird.f32 %v977_v0 }
  0x6d   : > { %v398_v11 = vadd.f32 %v947_v48, %v397_v19  ;;  %v448_v19 = vand.u32 2147483647, %v922_v38  ;;  %v466_v46 = vor.u32 1.1754944e-38, %v465_v26 }
  0x6e   : > { %vm1123_vm3 = vcmp.eq.f32.partialorder %v1288_v4, 8.507059e+37 }
  0x6f   : > { %v402_v52 = vsel %vm1055_vm14, %v947_v48, %v398_v11  ;;  %vm449_vm8 = vcmp.eq.f32.partialorder %v448_v19, 8.507059e+37  ;;  %v462_v48 = vsel %vm1089_vm0, %v958_v53, %v458_v37  ;;  %v392_v37 = vsel %vm1108_vm5, %v391_v6, %v387_v40  ;;  %vm1214_vm14 = vmor %vm429_vm10, %vm430_vm11 }
  0x70   : > { %v452_v45 = vsel %vm449_vm8, %v451_v62, %v447_v63  ;;  %v467_v7 = vsel %vm464_vm9, %v466_v46, %v462_v48 }
  0x72   : > { %v911_v29 = vpop.permute.xlu2 %277 }
  0x73   : > { %v295_v3 = vmul.f32 %v971_v60, %v911_v29  ;;  %v296_v33 = vmul.f32 %v979_v1, %v911_v29  ;;  %v407_v29 = vsel %vm1117_vm1, %v406_v47, %v402_v52 }
  0x7b   : > { %v931_v42 = vpop.permute.xlu2 %470 }
  0x80   : > { %v949_v49 = vpop.permute.xlu1 %251  ;;  %v951_v50 = vpop.permute.xlu0 %241 }
  0x83   : > { %v965_v57 = vpop.permute.xlu2 %478 }
  0x84   : > { %1269 = vst [vmem:[#allocation2_spill] sm:$0xff] %v965_v57  ;;  %v1083_v57 = vmul.f32 %v977_v0, %v426_v55 }
  0x88   : > { %v1000_v23 = vpop.permute.xlu1 %256  ;;  %v1002_v24 = vpop.permute.xlu0 %246 }
  0x89   : > { %v266_v14 = vmul.f32 %v981_v2, %v1002_v24  ;;  %v267_v53 = vmul.f32 %v987_v5, %v1002_v24  ;;  %v270_v19 = vmul.f32 %v981_v2, %v1000_v23  ;;  %v271_v36 = vmul.f32 %v987_v5, %v1000_v23 }
  0x8a   : > { %v362_v23 = vsel %vm1093_vm2, %v995_v18, %v357_v34  ;;  %v783_v18 = vpop.eup %782  ;;  %v377_v34 = vsel %vm1123_vm3, %v998_v21, %v372_v30  ;;  %v435_v21 = vand.u32 2147483648, %v933_v43 }
  0x8b   : > { %v303_v52 = vadd.f32 %v295_v3, %v266_v14  ;;  %v785_v30 = vpop.eup %784  ;;  %v485_v25 = vmul.f32 %v931_v42, %v362_v23  ;;  %v545_v43 = vmin.f32 %v783_v18, 1000.0 }
  0x8c   : > { %v1023_v56 = vpop.permute.xlu2 %498 }
  0x8d   : > { %v511_v26 = vmul.f32 %v1023_v56, %v890_v12  ;;  %v512_v24 = vmul.f32 %v1023_v56, %v892_v13 }
  0x91   : > { %v286_v27 = vpop.permute.xlu1 %285  ;;  %v1062_v35 = vpop.permute.xlu0 %281 }
  0x92   : > { %v299_v16 = vmul.f32 %v971_v60, %v286_v27  ;;  %v300_v38 = vmul.f32 %v979_v1, %v286_v27  ;;  %v413_v27 = vadd.f32 %v969_v59, %v412_v58  ;;  %v1293_v58 = vand.u32 2147483647, %v928_v41 }
  0x94   : > { %v507_v11 = vpop.permute.xlu2 %506  ;;  %v307_v55 = vadd.f32 %v299_v16, %v270_v19  ;;  %v308_v63 = vadd.f32 %v300_v38, %v271_v36  ;;  %vm1190_vm13 = vcmp.eq.f32.partialorder %v1293_v58, 8.507059e+37  ;;  %v428_v16 = vadd.f32 %v977_v0, %v1083_v57 }
  0x95   : > { %v515_v28 = vmul.f32 %v507_v11, %v895_v15  ;;  %v516_v54 = vmul.f32 %v507_v11, %v898_v17  ;;  %v304_v15 = vadd.f32 %v296_v33, %v267_v53  ;;  %v571_v53 = vmul.f32 1.442695, %v906_v22 }
  0x96   : > { %v432_v19 = vsel %vm1214_vm14, %v977_v0, %v428_v16  ;;  %v546_v38 = vmin.f32 %v785_v30, 1000.0 }
  0x97   : > { %788 = vpow2.f32 %v571_v53 }
  0x9a   : > { %v475_v44 = vpop.permute.xlu1 %474  ;;  %v483_v40 = vpop.permute.xlu0 %482 }
  0x9b   : > { %v487_v39 = vmul.f32 %v475_v44, %v392_v37  ;;  %v488_v6 = vmul.f32 %v475_v44, %v407_v29  ;;  %v491_v47 = vmul.f32 %v483_v40, %v452_v45  ;;  %v492_v56 = vmul.f32 %v483_v40, %v467_v7 }
  0x9c   : > { %v1296_v37 = vand.u32 2147483648, %v928_v41  ;;  %v264_v45 = vmul.f32 %v981_v2, %v951_v50  ;;  %v265_v7 = vmul.f32 %v987_v5, %v951_v50  ;;  %v417_v41 = vsel %vm1180_vm12, %v969_v59, %v413_v27 }
  0x9d   : > { %v519_v17 = vadd.f32 %v511_v26, %v487_v39  ;;  %v520_v62 = vadd.f32 %v512_v24, %v488_v6  ;;  %v523_v46 = vadd.f32 %v515_v28, %v491_v47  ;;  %v524_v4 = vadd.f32 %v516_v54, %v492_v56  ;;  %v787_v6 = vpop.eup %786 }
  0x9e   : > { %v421_v29 = vor.u32 1.1754944e-38, %v1296_v37  ;;  %v486_v26 = vmul.f32 %v931_v42, %v377_v34  ;;  %v555_v50 = vmul.f32 1.442695, %v890_v12  ;;  %v557_v28 = vmul.f32 1.442695, %v892_v13 }
  0x9f   : > { %v527_v3 = vadd.f32 %v519_v17, %v303_v52  ;;  %v528_v33 = vadd.f32 %v520_v62, %v304_v15  ;;  %v531_v11 = vadd.f32 %v523_v46, %v307_v55  ;;  %v532_v14 = vadd.f32 %v524_v4, %v308_v63  ;;  %v789_v52 = vpop.eup %788  ;;  %v1299_v17 = vld [vmem:[#allocation2_spill] sm:$0xff] }
  0xa0   : > { %v436_v42 = vor.u32 1.1754944e-38, %v435_v21  ;;  %v301_v12 = vadd.f32 %v1010_v31, %v264_v45  ;;  %v302_v13 = vadd.f32 %v1014_v32, %v265_v7  ;;  %790 = vpow2.f32 %v555_v50 }
  0xa1   : > { %535 = vst [vmem:[%s1169_s7 + $0x10] sm:$0xff] %v527_v3  ;;  %792 = vpow2.f32 %v557_v28  ;;  %v297_v31 = vmul.f32 %v971_v60, %v1062_v35  ;;  %v298_v32 = vmul.f32 %v979_v1, %v1062_v35  ;;  %v268_v15 = vmul.f32 %v981_v2, %v949_v49  ;;  %v577_v35 = vpop.permute.xlu2 %576 }
  0xa2   : > { %536 = vst [vmem:[%s1169_s7 + $0x18] sm:$0xff] %v528_v33  ;;  %v437_v47 = vsel %vm434_vm15, %v436_v42, %v432_v19  ;;  %v269_v55 = vmul.f32 %v987_v5, %v949_v49  ;;  %v573_v27 = vmin.f32 %v787_v6, 1000.0  ;;  %v574_v2 = vmin.f32 %v789_v52, 1000.0 }
  0xa3   : > { %539 = vst [vmem:[%s1169_s7 + $0x30] sm:$0x3f] %v531_v11  ;;  %v495_v24 = vpop.permute.xlu1 %494  ;;  %v490_v4 = vmul.f32 %v1299_v17, %v437_v47  ;;  %v305_v5 = vadd.f32 %v297_v31, %v268_v15 }
  0xa4   : > { %540 = vst [vmem:[%s1169_s7 + $0x38] sm:$0x3f] %v532_v14  ;;  %v509_v59 = vmul.f32 %v495_v24, %v885_v9  ;;  %v510_v54 = vmul.f32 %v495_v24, %v887_v10  ;;  %v549_v36 = vpop.permute.xlu0 %548  ;;  %v422_v9 = vsel %vm1190_vm13, %v421_v29, %v417_v41  ;;  %v306_v63 = vadd.f32 %v298_v32, %v269_v55 }
  0xa5   : > { %v551_v0 = vmul.f32 %v549_v36, %v545_v43  ;;  %v552_v56 = vmul.f32 %v549_v36, %v546_v38  ;;  %v489_v62 = vmul.f32 %v1299_v17, %v422_v9  ;;  %v580_v18 = vmul.f32 %v577_v35, %v574_v2 }
  0xa6   : > { %v517_v44 = vadd.f32 %v509_v59, %v485_v25  ;;  %v518_v40 = vadd.f32 %v510_v54, %v486_v26  ;;  %v791_v1 = vpop.eup %790 }
  0xa7   : > { %v793_v49 = vpop.eup %792  ;;  %v559_v11 = vmin.f32 %v791_v1, 1000.0 }
  0xa8   : > { %v525_v10 = vadd.f32 %v517_v44, %v301_v12  ;;  %v526_v39 = vadd.f32 %v518_v40, %v302_v13  ;;  %v560_v61 = vmin.f32 %v793_v49, 1000.0 }
  0xaa   : > { %533 = vst [vmem:[%s1169_s7] sm:$0xff] %v525_v10 }
  0xab   : > { %534 = vst [vmem:[%s1169_s7 + $0x8] sm:$0xff] %v526_v39  ;;  %v503_v46 = vpop.permute.xlu1 %502 }
  0xac   : > { %v513_v23 = vmul.f32 %v503_v46, %v903_v20  ;;  %v514_v60 = vmul.f32 %v503_v46, %v906_v22  ;;  %553 = vst [vmem:[%s1169_s7] sm:$0xc] %v551_v0  ;;  %v579_v22 = vmul.f32 %v577_v35, %v573_v27 }
  0xad   : > { %554 = vst [vmem:[%s1169_s7 + $0x8] sm:$0xc] %v552_v56 }
  0xae   : > { %v521_v48 = vadd.f32 %v513_v23, %v489_v62  ;;  %v522_v3 = vadd.f32 %v514_v60, %v490_v4 }
  0xb0   : > { %v529_v20 = vadd.f32 %v521_v48, %v305_v5  ;;  %v530_v33 = vadd.f32 %v522_v3, %v306_v63 }
  0xb2   : > { %537 = vst [vmem:[%s1169_s7 + $0x20] sm:$0xff] %v529_v20 }
  0xb3   : > { %538 = vst [vmem:[%s1169_s7 + $0x28] sm:$0xff] %v530_v33 }
  0xb4   : > { %v563_v34 = vpop.permute.xlu1 %562  ;;  %581 = vst [vmem:[%s1169_s7 + $0x20] sm:$0xc0] %v579_v22 }
  0xb5   : > { %v565_v58 = vmul.f32 %v563_v34, %v559_v11  ;;  %v566_v51 = vmul.f32 %v563_v34, %v560_v61  ;;  %582 = vst [vmem:[%s1169_s7 + $0x28] sm:$0xc0] %v580_v18 }
  0xb7   : > { %567 = vst [vmem:[%s1169_s7 + $0x10] sm:$0x30] %v565_v58 }
  0xb8   : > { %568 = vst [vmem:[%s1169_s7 + $0x18] sm:$0x30] %v566_v51 }
  0xb9 PF: > { %s13_s14 = sadd.s32 1, %s816_s14   ;;  %s1300_s12 = smov %s812_s13 }
  0xba   : > { %p10_p5 = scmp.ge.s32.totalorder %s13_s14, 4   ;;  %s1301_s13 = smov %s1303_s15 }
  0xbc   :  { %12 = sbr.rel (!%p10_p5) target bundleno = 2 (0x2), region = 66 }

</bundles_post_ra>
